<compile_context>
chip_gen: v6e
topology: v6e:2x2x1
jax: 0.10.0
libtpu: 0.0.40
codegen_flags: <defaults>
</compile_context>

<pallas_src>
import functools

import jax
import jax.numpy as jnp
from jax.experimental import pallas as pl
from jax.experimental.pallas import tpu as pltpu


# ---------------------------------------------------------------------------
# Kernel: fused Linear -> ReLU -> Linear on lane-packed rows.
# x arrives as f32 and is cast to bf16 in-kernel; MXU accumulates in f32.
# ---------------------------------------------------------------------------
def mlp_kernel(x_ref, w1_ref, b1_ref, w2_ref, b2_ref, o_ref):
    x = x_ref[...].astype(jnp.bfloat16)                      # in-kernel cast (free on VPU)
    h = jnp.dot(x, w1_ref[...], preferred_element_type=jnp.float32)
    h = jnp.maximum(h + b1_ref[...], 0.0)                    # bias + ReLU in f32
    h = h.astype(w2_ref.dtype)                               # back to bf16 for the MXU
    y = jnp.dot(h, w2_ref[...], preferred_element_type=jnp.float32) + b2_ref[...]
    o_ref[...] = y.astype(o_ref.dtype)                       # f32 or bf16 store


# ---------------------------------------------------------------------------
# One-time parameter packing (block-diagonal weights, tiled biases).
# ---------------------------------------------------------------------------
def _block_diag(w, p):
    """[k, n] -> [p*k, p*n] with p copies of w on the diagonal."""
    k, n = w.shape
    eye = jnp.eye(p, dtype=w.dtype)
    return (eye[:, None, :, None] * w[None, :, None, :]).reshape(p * k, p * n)


def prepare_params(w1, b1, w2, b2, pack):
    """Pack weights once (static parameters); cache and reuse the result."""
    w1_bd = _block_diag(jnp.asarray(w1), pack).astype(jnp.bfloat16)   # [P*in,  P*hid]
    w2_bd = _block_diag(jnp.asarray(w2), pack).astype(jnp.bfloat16)   # [P*hid, P*out]
    b1_bd = jnp.tile(jnp.asarray(b1), pack).reshape(1, -1).astype(jnp.float32)
    b2_bd = jnp.tile(jnp.asarray(b2), pack).reshape(1, -1).astype(jnp.float32)
    return w1_bd, b1_bd, w2_bd, b2_bd


# ---------------------------------------------------------------------------
# Per-chip auto-tuning helpers (run at trace time, pure Python).
# ---------------------------------------------------------------------------
def _chip_kind():
    try:
        return jax.devices()[0].device_kind.lower()
    except Exception:
        return ""


def _is_v5e():
    kind = _chip_kind()
    return ("v5 lite" in kind) or ("v5e" in kind) or ("v5litepod" in kind)


def default_pack():
    # v5e: block-diag FLOP inflation at pack=8 makes it MXU-bound -> pack=4.
    # v6e/v7x: HBM-bound, the extra issued FLOPs are hidden -> pack=8.
    return 4 if _is_v5e() else 8


def _auto_block_m(bp, cap):
    """Pick packed rows per grid step: multiple of 8 dividing bp, <= cap.
    Prefer >=4 grid steps with an even step count (v7x has 2 TensorCores and
    the pipeline needs a few steps to ramp), then the largest tile."""
    if bp % 8 != 0:
        return bp                                   # tiny/irregular batch: one full block
    best_bm, best_key = 8, None
    bm = 8
    limit = min(bp, cap)
    while bm <= limit:
        if bp % bm == 0:
            steps = bp // bm
            key = (steps >= 4, steps % 2 == 0 or steps == 1, bm)
            if best_key is None or key > best_key:
                best_bm, best_key = bm, key
        bm += 8
    return best_bm


# ---------------------------------------------------------------------------
# Main entry: x f32 [B, in_dim] + pre-packed params -> [B, out_dim].
# ---------------------------------------------------------------------------
@functools.partial(jax.jit, static_argnames=("pack", "block_m", "out_dtype"))
def neural_embedding_packed(x, w1_bd, b1_bd, w2_bd, b2_bd, *,
                            pack, block_m=None, out_dtype=jnp.float32):
    B, in_dim = x.shape
    ki, kh = w1_bd.shape
    ko = w2_bd.shape[1]
    assert ki == pack * in_dim, "packed weights do not match x / pack"
    out_dim = ko // pack

    # Pad batch so packed rows tile cleanly (trimmed at the end).
    pad_to = pack * 8
    B_pad = ((B + pad_to - 1) // pad_to) * pad_to
    if B_pad != B:
        x = jnp.pad(x, ((0, B_pad - B), (0, 0)))
    bp = B_pad // pack                                       # packed rows

    cap = 1024 if _is_v5e() else 2048
    bm = _auto_block_m(bp, cap) if block_m is None else block_m
    assert bp % bm == 0, "block_m must divide the packed batch"

    # Lane-pack rows (pure reshape, no dtype conversion pass).
    x_p = x.reshape(bp, ki)

    grid = (bp // bm,)
    out_itemsize = jnp.dtype(out_dtype).itemsize
    cost = pl.CostEstimate(
        flops=2 * bp * (ki * kh + kh * ko),
        transcendentals=0,
        bytes_accessed=(bp * ki * 4                    # x (f32 read)
                        + bp * ko * out_itemsize       # output
                        + (ki * kh + kh * ko) * 2      # bf16 weights
                        + (kh + ko) * 4),              # f32 biases
    )

    out_p = pl.pallas_call(
        mlp_kernel,
        out_shape=jax.ShapeDtypeStruct((bp, ko), out_dtype),
        grid_spec=pltpu.PrefetchScalarGridSpec(
            num_scalar_prefetch=0,
            grid=grid,
            in_specs=[
                pl.BlockSpec((bm, ki), lambda i: (i, 0)),    # streaming f32 x tile
                pl.BlockSpec((ki, kh), lambda i: (0, 0)),    # resident bf16 weights
                pl.BlockSpec((1, kh), lambda i: (0, 0)),
                pl.BlockSpec((kh, ko), lambda i: (0, 0)),
                pl.BlockSpec((1, ko), lambda i: (0, 0)),
            ],
            out_specs=pl.BlockSpec((bm, ko), lambda i: (i, 0)),   # lane-dense output
        ),
        compiler_params=pltpu.CompilerParams(
            dimension_semantics=("parallel",),
            vmem_limit_bytes=32 * 1024 * 1024,          # safe on v5e/v6e/v7x budgets
        ),
        cost_estimate=cost,
    )(x_p, w1_bd, b1_bd, w2_bd, b2_bd)

    # Unpack: [bp, P*out] -> [B_pad, out] -> trim padding.
    return out_p.reshape(B_pad, out_dim)[:B]


def neural_embedding(x, w1, b1, w2, b2, *, pack=None, block_m=None, out_dtype=jnp.float32):
    """Convenience one-shot wrapper (packs weights on every call). For repeated
    calls, use prepare_params once and call neural_embedding_packed."""
    if pack is None:
        pack = default_pack()
    packed = prepare_params(w1, b1, w2, b2, pack)
    return neural_embedding_packed(x, *packed, pack=pack, block_m=block_m,
                                   out_dtype=out_dtype)


if __name__ == "__main__":
    # NeuralEmbedding(in_dim=32, out_dim=16); hidden is fixed at 64 by the module.
    batch, in_dim, hidden, out_dim = 128, 32, 64, 16

    key = jax.random.PRNGKey(0)
    kx, kw1, kb1, kw2, kb2 = jax.random.split(key, 5)

    x = jax.random.normal(kx, (batch, in_dim), dtype=jnp.float32)

    # Deterministic synthetic parameters (PyTorch layout [out, in], then transposed).
    w1_pt = jax.random.normal(kw1, (hidden, in_dim), dtype=jnp.float32) * 0.1
    b1 = jax.random.normal(kb1, (hidden,), dtype=jnp.float32) * 0.1
    w2_pt = jax.random.normal(kw2, (out_dim, hidden), dtype=jnp.float32) * 0.1
    b2 = jax.random.normal(kb2, (out_dim,), dtype=jnp.float32) * 0.1

    w1 = w1_pt.T  # [in_dim, hidden]
    w2 = w2_pt.T  # [hidden, out_dim]

    # Per-chip pack; pack weights ONCE and reuse.
    pack = default_pack()
    packed = prepare_params(w1, b1, w2, b2, pack)
    packed = jax.block_until_ready(packed)

    out = neural_embedding_packed(x, *packed, pack=pack)            # f32 output
    out = jax.block_until_ready(out)
    assert out.shape == (batch, out_dim)

    # References: x/W/h rounded to bf16 exactly as in the kernel (tight check),
    # plus a full-f32 reference (loose check, bf16 rounding only).
    xb = x.astype(jnp.bfloat16).astype(jnp.float32)
    w1b = w1.astype(jnp.bfloat16).astype(jnp.float32)
    w2b = w2.astype(jnp.bfloat16).astype(jnp.float32)
    h_ref = jnp.maximum(xb @ w1b + b1, 0.0).astype(jnp.bfloat16).astype(jnp.float32)
    ref_bf16 = h_ref @ w2b + b2
    assert jnp.allclose(out, ref_bf16, atol=1e-3, rtol=1e-3), "mismatch vs bf16 reference"

    ref_f32 = jnp.maximum(x @ w1 + b1, 0.0) @ w2 + b2
    assert jnp.allclose(out, ref_f32, atol=5e-2, rtol=5e-2), "mismatch vs f32 reference"

    # bf16-output path (halved writeback) — loose check only.
    out_bf16 = neural_embedding_packed(x, *packed, pack=pack, out_dtype=jnp.bfloat16)
    out_bf16 = jax.block_until_ready(out_bf16)
    assert out_bf16.shape == (batch, out_dim) and out_bf16.dtype == jnp.bfloat16
    assert jnp.allclose(out_bf16.astype(jnp.float32), ref_bf16, atol=3e-2, rtol=3e-2), \
        "mismatch vs bf16 reference (bf16 output path)"

    print("KERNEL_OK")
</pallas_src>

<mosaic_0001>
module attributes {stable_mosaic.version = 11 : i64} {
  func.func @mlp_kernel(%arg0: i32, %arg1: memref<16x256xf32, #tpu.memory_space<vmem>>, %arg2: memref<256x512xbf16, #tpu.memory_space<vmem>>, %arg3: memref<1x512xf32, #tpu.memory_space<vmem>>, %arg4: memref<512x128xbf16, #tpu.memory_space<vmem>>, %arg5: memref<1x128xf32, #tpu.memory_space<vmem>>, %arg6: memref<16x128xf32, #tpu.memory_space<vmem>>) attributes {dimension_semantics = [#tpu.dimension_semantics<parallel>], iteration_bounds = array<i64: 1>, scalar_prefetch = 0 : i64, scratch_operands = 0 : i64, tpu.core_type = #tpu.core_type<tc>, window_params = [{transform_indices = @transform_0, window_bounds = array<i64: 16, 256>}, {pipeline_mode = #tpu.pipeline_mode<synchronous>, transform_indices = @transform_1, window_bounds = array<i64: 256, 512>}, {pipeline_mode = #tpu.pipeline_mode<synchronous>, transform_indices = @transform_2, window_bounds = array<i64: 1, 512>}, {pipeline_mode = #tpu.pipeline_mode<synchronous>, transform_indices = @transform_3, window_bounds = array<i64: 512, 128>}, {pipeline_mode = #tpu.pipeline_mode<synchronous>, transform_indices = @transform_4, window_bounds = array<i64: 1, 128>}, {transform_indices = @transform_5, window_bounds = array<i64: 16, 128>}]} {
    %c0 = arith.constant 0 : index
    %c0_0 = arith.constant 0 : index
    %0 = vector.load %arg1[%c0, %c0_0] : memref<16x256xf32, #tpu.memory_space<vmem>>, vector<16x256xf32>
    %1 = arith.truncf %0 : vector<16x256xf32> to vector<16x256xbf16>
    %c0_1 = arith.constant 0 : index
    %c0_2 = arith.constant 0 : index
    %2 = vector.load %arg2[%c0_1, %c0_2] : memref<256x512xbf16, #tpu.memory_space<vmem>>, vector<256x512xbf16>
    %cst = arith.constant dense<0.000000e+00> : vector<16x512xf32>
    %3 = tpu.matmul %1, %2, %cst {dimension_numbers = #tpu.dot_dimension_numbers<[1], [0], [0], [1], [0, 0, 1, 1], [], []>} : vector<16x256xbf16>, vector<256x512xbf16>, vector<16x512xf32> -> vector<16x512xf32>
    %c0_3 = arith.constant 0 : index
    %c0_4 = arith.constant 0 : index
    %4 = vector.load %arg3[%c0_3, %c0_4] : memref<1x512xf32, #tpu.memory_space<vmem>>, vector<1x512xf32>
    %5 = vector.broadcast %4 : vector<1x512xf32> to vector<16x512xf32>
    %6 = arith.addf %3, %5 : vector<16x512xf32>
    %cst_5 = arith.constant 0.000000e+00 : f32
    %7 = vector.broadcast %cst_5 : f32 to vector<16x512xf32>
    %8 = arith.maximumf %6, %7 : vector<16x512xf32>
    %9 = arith.truncf %8 : vector<16x512xf32> to vector<16x512xbf16>
    %c0_6 = arith.constant 0 : index
    %c0_7 = arith.constant 0 : index
    %10 = vector.load %arg4[%c0_6, %c0_7] : memref<512x128xbf16, #tpu.memory_space<vmem>>, vector<512x128xbf16>
    %cst_8 = arith.constant dense<0.000000e+00> : vector<16x128xf32>
    %11 = tpu.matmul %9, %10, %cst_8 {dimension_numbers = #tpu.dot_dimension_numbers<[1], [0], [0], [1], [0, 0, 1, 1], [], []>} : vector<16x512xbf16>, vector<512x128xbf16>, vector<16x128xf32> -> vector<16x128xf32>
    %c0_9 = arith.constant 0 : index
    %c0_10 = arith.constant 0 : index
    %12 = vector.load %arg5[%c0_9, %c0_10] : memref<1x128xf32, #tpu.memory_space<vmem>>, vector<1x128xf32>
    %13 = vector.broadcast %12 : vector<1x128xf32> to vector<16x128xf32>
    %14 = arith.addf %11, %13 : vector<16x128xf32>
    %c0_11 = arith.constant 0 : index
    %c0_12 = arith.constant 0 : index
    %15 = vector.load %arg6[%c0_11, %c0_12] : memref<16x128xf32, #tpu.memory_space<vmem>>, vector<16x128xf32>
    tpu.vector_store %arg6[%c0_11, %c0_12], %14 {strides = array<i32>} : memref<16x128xf32, #tpu.memory_space<vmem>>, vector<16x128xf32>,
    return
  }
  func.func @transform_0(%arg0: i32) -> (i32, i32) {
    %c0_i32 = arith.constant 0 : i32
    %c0_i32_0 = arith.constant 0 : i32
    return %arg0, %c0_i32 : i32, i32
  }
  func.func @transform_1(%arg0: i32) -> (i32, i32) {
    %c0_i32 = arith.constant 0 : i32
    %c0_i32_0 = arith.constant 0 : i32
    %c0_i32_1 = arith.constant 0 : i32
    return %c0_i32, %c0_i32_0 : i32, i32
  }
  func.func @transform_2(%arg0: i32) -> (i32, i32) {
    %c0_i32 = arith.constant 0 : i32
    %c0_i32_0 = arith.constant 0 : i32
    %c0_i32_1 = arith.constant 0 : i32
    return %c0_i32, %c0_i32_0 : i32, i32
  }
  func.func @transform_3(%arg0: i32) -> (i32, i32) {
    %c0_i32 = arith.constant 0 : i32
    %c0_i32_0 = arith.constant 0 : i32
    %c0_i32_1 = arith.constant 0 : i32
    return %c0_i32, %c0_i32_0 : i32, i32
  }
  func.func @transform_4(%arg0: i32) -> (i32, i32) {
    %c0_i32 = arith.constant 0 : i32
    %c0_i32_0 = arith.constant 0 : i32
    %c0_i32_1 = arith.constant 0 : i32
    return %c0_i32, %c0_i32_0 : i32, i32
  }
  func.func @transform_5(%arg0: i32) -> (i32, i32) {
    %c0_i32 = arith.constant 0 : i32
    %c0_i32_0 = arith.constant 0 : i32
    return %arg0, %c0_i32 : i32, i32
  }
}

</mosaic_0001>

<bundles_post_ra>
// kernel: neural_embedding_packed.1
= control target key start
LH: loop header
LB: loop body
LE: loop exit
PB: predicated region body
PF: predicated region fallthrough
CT: control target
= control target key end

     0   :  { %10 = vsyncpa [#allocation3], 0  ;;  %s1191_s18 = smov [#allocation2]   ;;  %s1347_s0 = inlined_call_operand.vmem [shape: f32[16,256], index: 0, kind: input, shape index: {}]   ;;  %s1348_s1 = inlined_call_operand.hbm [shape: bf16[256,512], index: 1, kind: input, shape index: {}]   ;;  %s1349_s2 = inlined_call_operand.vmem [shape: f32[1,512], index: 2, kind: input, shape index: {}]   ;;  %s1350_s3 = inlined_call_operand.vmem [shape: bf16[512,128], index: 3, kind: input, shape index: {}]   ;;  %s1351_s4 = inlined_call_operand.vmem [shape: f32[1,128], index: 4, kind: input, shape index: {}]   ;;  %s1352_s5 = inlined_call_operand.vmem [shape: f32[16,128], index: 5, kind: output, shape index: {}]  }
   0x1   :  { %s18_s19 = sshll.u32 %s1191_s18, 4  ;;  %s19_s19 = int_to_ptr.vmem [resolvable:$true] %s18_s19 }
   0x2   :  { %s1177_s20 = scalar_lea.vmem %s19_s19, 8192  ;;  %p1182_p1 = scmp.lt.s32.totalorder %s19_s19, %s19_s19 }
   0x3   :  { %p1178_p0 = scmp.ne.s32.totalorder %s19_s19, %s1177_s20  ;;  %p1183_p2 = scmp.lt.s32.totalorder %s1177_s20, %s1177_s20 }
   0x5   :  { %p1184_p3 = por %p1183_p2, %p1182_p1 }
   0x7   :  { %p1185_p4 = pnand %p1184_p3, %p1178_p0 }
   0x9   :  { %1188 = shalt.err (!%p1185_p4)
}
   0xa   :  { %s1192_s21 = smov 256   ;;  %s1193_s22 = smov 16  }
   0xb   :  { %24 = dma.hbm_to_vmem [thread:$0]  %s1348_s1, 8192, %s19_s19, [#allocation3], %s1192_s21, %s1192_s21, %s1193_s22  }
   0xc   :  { %1189 = dma.done.wait [#allocation3], 8192  }
   0xd   :  { %1190 = vsyncadd [#allocation3], 4294959104  ;;  %v1041_v0 = vld [vmem:[#allocation2 + $0xe4] ss:$16 sps:$4 sm:$0xff]   ;;  %v1043_v1 = vld [vmem:[#allocation2 + $0xec] ss:$16 sps:$4 sm:$0xff]  }
   0xe   :  { %447 = vmatprep.subr.bf16.mxu0 %v1041_v0  ;;  %v1045_v2 = vld [vmem:[#allocation2 + $0xe0] ss:$16 sps:$4 sm:$0xff]   ;;  %v1046_v3 = vld [vmem:[#allocation2 + $0xe8] ss:$16 sps:$4 sm:$0xff]   ;;  %490 = vmatprep.subr.bf16.mxu1 %v1043_v1  ;;  %v1047_v4 = vld [vmem:[#allocation2 + $0xc4] ss:$16 sps:$4 sm:$0xff]  }
   0xf   :  { %448 = vmatpush1.bf16.msra.mxu0 %v1045_v2  ;;  %491 = vmatpush1.bf16.msra.mxu1 %v1046_v3  ;;  %v1049_v5 = vld [vmem:[#allocation2 + $0xcc] ss:$16 sps:$4 sm:$0xff]   ;;  %v1051_v6 = vld [vmem:[#allocation2 + $0xc0] ss:$16 sps:$4 sm:$0xff]   ;;  %v1052_v7 = vld [vmem:[#allocation2 + $0xc8] ss:$16 sps:$4 sm:$0xff]  }
  0x10   :  { %449 = vmatprep.subr.bf16.mxu0 %v1047_v4  ;;  %492 = vmatprep.subr.bf16.mxu1 %v1049_v5  ;;  %v1053_v8 = vld [vmem:[#allocation2 + $0xa4] ss:$16 sps:$4 sm:$0xff]   ;;  %v1055_v9 = vld [vmem:[#allocation2 + $0xac] ss:$16 sps:$4 sm:$0xff]   ;;  %v1057_v10 = vld [vmem:[#allocation2 + $0xa0] ss:$16 sps:$4 sm:$0xff]  }
  0x11   :  { %v1058_v11 = vld [vmem:[#allocation2 + $0xa8] ss:$16 sps:$4 sm:$0xff]   ;;  %v1059_v12 = vld [vmem:[#allocation2 + $0x84] ss:$16 sps:$4 sm:$0xff]   ;;  %v1061_v13 = vld [vmem:[#allocation2 + $0x8c] ss:$16 sps:$4 sm:$0xff]  }
  0x12   :  { %v1063_v14 = vld [vmem:[#allocation2 + $0x80] ss:$16 sps:$4 sm:$0xff]   ;;  %v1064_v15 = vld [vmem:[#allocation2 + $0x88] ss:$16 sps:$4 sm:$0xff]   ;;  %v1065_v16 = vld [vmem:[#allocation2 + $0x64] ss:$16 sps:$4 sm:$0xff]  }
  0x13   :  { %450 = vmatpush1.bf16.msra.mxu0 %v1051_v6  ;;  %493 = vmatpush1.bf16.msra.mxu1 %v1052_v7  ;;  %v1067_v17 = vld [vmem:[#allocation2 + $0x6c] ss:$16 sps:$4 sm:$0xff]   ;;  %v1069_v18 = vld [vmem:[#allocation2 + $0x60] ss:$16 sps:$4 sm:$0xff]   ;;  %v1070_v19 = vld [vmem:[#allocation2 + $0x68] ss:$16 sps:$4 sm:$0xff]  }
  0x14   :  { %451 = vmatprep.subr.bf16.mxu0 %v1053_v8  ;;  %494 = vmatprep.subr.bf16.mxu1 %v1055_v9  ;;  %v1071_v20 = vld [vmem:[#allocation2 + $0x44] ss:$16 sps:$4 sm:$0xff]   ;;  %v1073_v21 = vld [vmem:[#allocation2 + $0x4c] ss:$16 sps:$4 sm:$0xff]   ;;  %v1075_v22 = vld [vmem:[#allocation2 + $0x40] ss:$16 sps:$4 sm:$0xff]  }
  0x15   :  { %v1076_v23 = vld [vmem:[#allocation2 + $0x48] ss:$16 sps:$4 sm:$0xff]   ;;  %v1077_v24 = vld [vmem:[#allocation2 + $0x24] ss:$16 sps:$4 sm:$0xff]   ;;  %v1079_v25 = vld [vmem:[#allocation2 + $0x2c] ss:$16 sps:$4 sm:$0xff]  }
  0x16   :  { %v1081_v26 = vld [vmem:[#allocation2 + $0x20] ss:$16 sps:$4 sm:$0xff]   ;;  %v1082_v27 = vld [vmem:[#allocation2 + $0x28] ss:$16 sps:$4 sm:$0xff]   ;;  %v1083_v28 = vld [vmem:[#allocation2 + $0x4] ss:$16 sps:$4 sm:$0xff]  }
  0x17   :  { %452 = vmatpush1.bf16.msra.mxu0 %v1057_v10  ;;  %495 = vmatpush1.bf16.msra.mxu1 %v1058_v11  ;;  %v1085_v29 = vld [vmem:[#allocation2 + $0xc] ss:$16 sps:$4 sm:$0xff]   ;;  %v1087_v30 = vld [vmem:[#allocation2] ss:$16 sps:$4 sm:$0xff]   ;;  %v1088_v31 = vld [vmem:[#allocation2 + $0x8] ss:$16 sps:$4 sm:$0xff]  }
  0x18   :  { %453 = vmatprep.subr.bf16.mxu0 %v1059_v12  ;;  %496 = vmatprep.subr.bf16.mxu1 %v1061_v13  ;;  %v1089_v32 = vld [vmem:[#allocation2 + $0x1e4] ss:$16 sps:$4 sm:$0xff]   ;;  %v1091_v33 = vld [vmem:[#allocation2 + $0x1ec] ss:$16 sps:$4 sm:$0xff]   ;;  %v1093_v34 = vld [vmem:[#allocation2 + $0x1e0] ss:$16 sps:$4 sm:$0xff]  }
  0x19   :  { %v1094_v35 = vld [vmem:[#allocation2 + $0x1e8] ss:$16 sps:$4 sm:$0xff]   ;;  %v1095_v36 = vld [vmem:[#allocation2 + $0x1c4] ss:$16 sps:$4 sm:$0xff]   ;;  %v1097_v37 = vld [vmem:[#allocation2 + $0x1cc] ss:$16 sps:$4 sm:$0xff]  }
  0x1a   :  { %v1099_v38 = vld [vmem:[#allocation2 + $0x1c0] ss:$16 sps:$4 sm:$0xff]   ;;  %v1100_v39 = vld [vmem:[#allocation2 + $0x1c8] ss:$16 sps:$4 sm:$0xff]   ;;  %v1101_v40 = vld [vmem:[#allocation2 + $0x1a4] ss:$16 sps:$4 sm:$0xff]  }
  0x1b   :  { %454 = vmatpush1.bf16.msra.mxu0 %v1063_v14  ;;  %497 = vmatpush1.bf16.msra.mxu1 %v1064_v15  ;;  %v1103_v41 = vld [vmem:[#allocation2 + $0x1ac] ss:$16 sps:$4 sm:$0xff]   ;;  %v1105_v42 = vld [vmem:[#allocation2 + $0x1a0] ss:$16 sps:$4 sm:$0xff]   ;;  %v1106_v43 = vld [vmem:[#allocation2 + $0x1a8] ss:$16 sps:$4 sm:$0xff]  }
  0x1c   :  { %455 = vmatprep.subr.bf16.mxu0 %v1065_v16  ;;  %498 = vmatprep.subr.bf16.mxu1 %v1067_v17  ;;  %v1107_v44 = vld [vmem:[#allocation2 + $0x184] ss:$16 sps:$4 sm:$0xff]   ;;  %v1109_v45 = vld [vmem:[#allocation2 + $0x18c] ss:$16 sps:$4 sm:$0xff]   ;;  %v1111_v47 = vld [vmem:[#allocation2 + $0x180] ss:$16 sps:$4 sm:$0xff]  }
  0x1d   :  { %v36_v46 = vld [vmem:[%s1347_s0 + $0x8] sm:$0xff]  ;;  %v38_v49 = vld [vmem:[%s1347_s0 + $0x18] sm:$0xff]  ;;  %v1113_v50 = vld [vmem:[#allocation2 + $0x164] ss:$16 sps:$4 sm:$0xff]  }
  0x1e   :  { %v1112_v48 = vld [vmem:[#allocation2 + $0x188] ss:$16 sps:$4 sm:$0xff]   ;;  %v40_v51 = vpack.c.bf16 %v38_v49, %v36_v46  ;;  %v1115_v52 = vld [vmem:[#allocation2 + $0x16c] ss:$16 sps:$4 sm:$0xff]   ;;  %v1117_v53 = vld [vmem:[#allocation2 + $0x160] ss:$16 sps:$4 sm:$0xff]  }
  0x1f   :  { %456 = vmatpush1.bf16.msra.mxu0 %v1069_v18  ;;  %499 = vmatpush1.bf16.msra.mxu1 %v1070_v19  ;;  %v1118_v54 = vld [vmem:[#allocation2 + $0x168] ss:$16 sps:$4 sm:$0xff]   ;;  %v1119_v55 = vld [vmem:[#allocation2 + $0x144] ss:$16 sps:$4 sm:$0xff]   ;;  %v1121_v56 = vld [vmem:[#allocation2 + $0x14c] ss:$16 sps:$4 sm:$0xff]  }
  0x20   :  { %457 = vmatprep.subr.bf16.mxu0 %v1071_v20  ;;  %500 = vmatprep.subr.bf16.mxu1 %v1073_v21  ;;  %v1123_v57 = vld [vmem:[#allocation2 + $0x140] ss:$16 sps:$4 sm:$0xff]   ;;  %v1124_v58 = vld [vmem:[#allocation2 + $0x148] ss:$16 sps:$4 sm:$0xff]   ;;  %v1125_v59 = vld [vmem:[#allocation2 + $0x124] ss:$16 sps:$4 sm:$0xff]  }
  0x21   :  { %479 = vmatprep.mubr.bf16.mxu0 %v40_v51  ;;  %522 = vmatprep.mubr.bf16.mxu1 %v40_v51  ;;  %v1127_v60 = vld [vmem:[#allocation2 + $0x12c] ss:$16 sps:$4 sm:$0xff]   ;;  %v1129_v61 = vld [vmem:[#allocation2 + $0x120] ss:$16 sps:$4 sm:$0xff]   ;;  %v1130_v62 = vld [vmem:[#allocation2 + $0x128] ss:$16 sps:$4 sm:$0xff]  }
  0x22   :  { %v1131_v63 = vld [vmem:[#allocation2 + $0x104] ss:$16 sps:$4 sm:$0xff]   ;;  %v1133_v0 = vld [vmem:[#allocation2 + $0x10c] ss:$16 sps:$4 sm:$0xff]   ;;  %v1135_v1 = vld [vmem:[#allocation2 + $0x100] ss:$16 sps:$4 sm:$0xff]  }
  0x23   :  { %458 = vmatpush1.bf16.msra.mxu0 %v1075_v22  ;;  %501 = vmatpush1.bf16.msra.mxu1 %v1076_v23  ;;  %v1136_v2 = vld [vmem:[#allocation2 + $0x108] ss:$16 sps:$4 sm:$0xff]   ;;  %v35_v3 = vld [vmem:[%s1347_s0] sm:$0xff]  ;;  %v37_v4 = vld [vmem:[%s1347_s0 + $0x10] sm:$0xff] }
  0x24   :  { %459 = vmatprep.subr.bf16.mxu0 %v1077_v24  ;;  %502 = vmatprep.subr.bf16.mxu1 %v1079_v25  ;;  %v1137_v5 = vld [vmem:[%s1350_s3 + $0x78] sm:$0xff]   ;;  %v39_v9 = vpack.c.bf16 %v37_v4, %v35_v3  ;;  %v1141_v10 = vld [vmem:[%s1350_s3 + $0x70] sm:$0xff]   ;;  %v1145_v14 = vld [vmem:[%s1350_s3 + $0x68] sm:$0xff]  }
  0x25   :  { %v1138_v6 = vld [vmem:[%s1350_s3 + $0xf8] sm:$0xff]   ;;  %v1142_v11 = vld [vmem:[%s1350_s3 + $0xf0] sm:$0xff]   ;;  %v1146_v15 = vld [vmem:[%s1350_s3 + $0xe8] sm:$0xff]  }
  0x26   :  { %v1139_v7 = vld [vmem:[%s1350_s3 + $0x38] sm:$0xff]   ;;  %v1143_v12 = vld [vmem:[%s1350_s3 + $0x30] sm:$0xff]   ;;  %v1147_v16 = vld [vmem:[%s1350_s3 + $0x28] sm:$0xff]  }
  0x27   :  { %460 = vmatpush1.bf16.msra.mxu0 %v1081_v26  ;;  %503 = vmatpush1.bf16.msra.mxu1 %v1082_v27  ;;  %v1140_v8 = vld [vmem:[%s1350_s3 + $0xb8] sm:$0xff]   ;;  %v1144_v13 = vld [vmem:[%s1350_s3 + $0xb0] sm:$0xff]   ;;  %v1148_v17 = vld [vmem:[%s1350_s3 + $0xa8] sm:$0xff]  }
  0x28   :  { %461 = vmatprep.subr.bf16.mxu0 %v1083_v28  ;;  %504 = vmatprep.subr.bf16.mxu1 %v1085_v29  ;;  %v1149_v18 = vld [vmem:[%s1350_s3 + $0x60] sm:$0xff]   ;;  %v1153_v22 = vld [vmem:[%s1350_s3 + $0x58] sm:$0xff]   ;;  %v1157_v26 = vld [vmem:[%s1350_s3 + $0x50] sm:$0xff]  }
  0x29   :  { %v1150_v19 = vld [vmem:[%s1350_s3 + $0xe0] sm:$0xff]   ;;  %v1154_v23 = vld [vmem:[%s1350_s3 + $0xd8] sm:$0xff]   ;;  %v1158_v27 = vld [vmem:[%s1350_s3 + $0xd0] sm:$0xff]  }
  0x2a   :  { %v1151_v20 = vld [vmem:[%s1350_s3 + $0x20] sm:$0xff]   ;;  %v1155_v24 = vld [vmem:[%s1350_s3 + $0x18] sm:$0xff]   ;;  %v1159_v28 = vld [vmem:[%s1350_s3 + $0x10] sm:$0xff]  }
  0x2b   :  { %462 = vmatpush1.bf16.msra.mxu0 %v1087_v30  ;;  %505 = vmatpush1.bf16.msra.mxu1 %v1088_v31  ;;  %v1152_v21 = vld [vmem:[%s1350_s3 + $0xa0] sm:$0xff]   ;;  %v1156_v25 = vld [vmem:[%s1350_s3 + $0x98] sm:$0xff]   ;;  %v1160_v29 = vld [vmem:[%s1350_s3 + $0x90] sm:$0xff]  }
  0x2c   :  { %463 = vmatprep.subr.bf16.mxu0 %v1089_v32  ;;  %506 = vmatprep.subr.bf16.mxu1 %v1091_v33  ;;  %v1161_v30 = vld [vmem:[%s1350_s3 + $0x48] sm:$0xff]  }
  0x2d   :  { %v1162_v31 = vld [vmem:[%s1350_s3 + $0xc8] sm:$0xff]  }
  0x2e   :  { %v1163_v32 = vld [vmem:[%s1350_s3 + $0x8] sm:$0xff]  }
  0x2f   :  { %464 = vmatpush2.bf16.msra.mxu0 %v1093_v34  ;;  %507 = vmatpush2.bf16.msra.mxu1 %v1094_v35  ;;  %v1164_v33 = vld [vmem:[%s1350_s3 + $0x88] sm:$0xff]   ;;  %v1165_v34 = vld [vmem:[%s1350_s3 + $0x40] sm:$0xff]  }
  0x30   :  { %465 = vmatprep.subr.bf16.mxu0 %v1095_v36  ;;  %508 = vmatprep.subr.bf16.mxu1 %v1097_v37  ;;  %v1166_v35 = vld [vmem:[%s1350_s3 + $0xc0] sm:$0xff]  }
  0x31   :  { %v1167_v36 = vld [vmem:[%s1350_s3] sm:$0xff]  }
  0x32   :  { %v1168_v37 = vld [vmem:[%s1350_s3 + $0x80] sm:$0xff]  }
  0x33   :  { %466 = vmatpush2.bf16.msra.mxu0 %v1099_v38  ;;  %509 = vmatpush2.bf16.msra.mxu1 %v1100_v39  ;;  %v107_v38 = vlaneseq }
  0x34   :  { %467 = vmatprep.subr.bf16.mxu0 %v1101_v40  ;;  %510 = vmatprep.subr.bf16.mxu1 %v1103_v41 }
  0x35   :  { %v108_v39 = vshrl.u32 %v107_v38, 7 }
  0x37   :  { %468 = vmatpush2.bf16.msra.mxu0 %v1105_v42  ;;  %511 = vmatpush2.bf16.msra.mxu1 %v1106_v43  ;;  %v113_v40 = vsub.s32 1, %v108_v39  ;;  %v121_v41 = vsub.s32 3, %v108_v39  ;;  %v109_v42 = vsub.s32 0, %v108_v39  ;;  %v117_v43 = vsub.s32 2, %v108_v39 }
  0x38   :  { %469 = vmatprep.subr.bf16.mxu0 %v1107_v44  ;;  %512 = vmatprep.subr.bf16.mxu1 %v1109_v45  ;;  %v105_v44 = vld [vmem:[%s1349_s2] sm:$0xf] }
  0x39   :  { %v110_v49 = vrot.slane %v105_v44, %v109_v42 }
  0x3b   :  { %470 = vmatpush2.bf16.msra.mxu0 %v1111_v47  ;;  %513 = vmatpush2.bf16.msra.mxu1 %v1112_v48  ;;  %v114_v47 = vrot.slane %v105_v44, %v113_v40  ;;  %v122_v48 = vrot.slane %v105_v44, %v121_v41 }
  0x3c   :  { %471 = vmatprep.subr.bf16.mxu0 %v1113_v50  ;;  %514 = vmatprep.subr.bf16.mxu1 %v1115_v52  ;;  %v118_v50 = vrot.slane %v105_v44, %v117_v43 }
  0x3f   :  { %472 = vmatpush2.bf16.msra.mxu0 %v1117_v53  ;;  %515 = vmatpush2.bf16.msra.mxu1 %v1118_v54 }
  0x40   :  { %473 = vmatprep.subr.bf16.mxu0 %v1119_v55  ;;  %516 = vmatprep.subr.bf16.mxu1 %v1121_v56 }
  0x43   :  { %474 = vmatpush2.bf16.msra.mxu0 %v1123_v57  ;;  %517 = vmatpush2.bf16.msra.mxu1 %v1124_v58 }
  0x44   :  { %475 = vmatprep.subr.bf16.mxu0 %v1125_v59  ;;  %518 = vmatprep.subr.bf16.mxu1 %v1127_v60 }
  0x47   :  { %476 = vmatpush2.bf16.msra.mxu0 %v1129_v61  ;;  %519 = vmatpush2.bf16.msra.mxu1 %v1130_v62 }
  0x48   :  { %477 = vmatprep.subr.bf16.mxu0 %v1131_v63  ;;  %520 = vmatprep.subr.bf16.mxu1 %v1133_v0 }
  0x4b   :  { %478 = vmatpush2.bf16.msra.mxu0 %v1135_v1  ;;  %521 = vmatpush2.bf16.msra.mxu1 %v1136_v2 }
  0x4c   :  { %994 = vmatprep.subr.bf16.mxu0 %v1137_v5  ;;  %1016 = vmatprep.subr.bf16.mxu1 %v1138_v6 }
  0x4e   :  { %480 = vmatmul.mubr.bf16.vlgmr.msra.gmra.mxu0 %v39_v9  ;;  %523 = vmatmul.mubr.bf16.vlgmr.msra.gmra.mxu1 %v39_v9 }
  0x4f   :  { %995 = vmatpush3.bf16.msra.mxu0 %v1139_v7  ;;  %1017 = vmatpush3.bf16.msra.mxu1 %v1140_v8 }
  0x50   :  { %996 = vmatprep.subr.bf16.mxu0 %v1141_v10  ;;  %1018 = vmatprep.subr.bf16.mxu1 %v1142_v11 }
  0x53   :  { %997 = vmatpush3.bf16.msra.mxu0 %v1143_v12  ;;  %1019 = vmatpush3.bf16.msra.mxu1 %v1144_v13 }
  0x54   :  { %998 = vmatprep.subr.bf16.mxu0 %v1145_v14  ;;  %1020 = vmatprep.subr.bf16.mxu1 %v1146_v15  ;;  %v961_v15 = vld [vmem:[%s1351_s4] ss:$0 sm:$0xff] }
  0x57   :  { %999 = vmatpush3.bf16.msra.mxu0 %v1147_v16  ;;  %1021 = vmatpush3.bf16.msra.mxu1 %v1148_v17 }
  0x58   :  { %1000 = vmatprep.subr.bf16.mxu0 %v1149_v18  ;;  %1022 = vmatprep.subr.bf16.mxu1 %v1150_v19 }
  0x5b   :  { %1001 = vmatpush3.bf16.msra.mxu0 %v1151_v20  ;;  %1023 = vmatpush3.bf16.msra.mxu1 %v1152_v21 }
  0x5c   :  { %1002 = vmatprep.subr.bf16.mxu0 %v1153_v22  ;;  %1024 = vmatprep.subr.bf16.mxu1 %v1154_v23 }
  0x5f   :  { %1003 = vmatpush3.bf16.msra.mxu0 %v1155_v24  ;;  %1025 = vmatpush3.bf16.msra.mxu1 %v1156_v25 }
  0x60   :  { %1004 = vmatprep.subr.bf16.mxu0 %v1157_v26  ;;  %1026 = vmatprep.subr.bf16.mxu1 %v1158_v27 }
  0x63   :  { %1005 = vmatpush3.bf16.msra.mxu0 %v1159_v28  ;;  %1027 = vmatpush3.bf16.msra.mxu1 %v1160_v29 }
  0x64   :  { %1006 = vmatprep.subr.bf16.mxu0 %v1161_v30  ;;  %1028 = vmatprep.subr.bf16.mxu1 %v1162_v31 }
  0x67   :  { %1007 = vmatpush3.bf16.msra.mxu0 %v1163_v32  ;;  %1029 = vmatpush3.bf16.msra.mxu1 %v1164_v33 }
  0x68   :  { %1008 = vmatprep.subr.bf16.mxu0 %v1165_v34  ;;  %1030 = vmatprep.subr.bf16.mxu1 %v1166_v35 }
  0x6b   :  { %1009 = vmatpush3.bf16.msra.mxu0 %v1167_v36  ;;  %1031 = vmatpush3.bf16.msra.mxu1 %v1168_v37 }
 0x10e   :  { %v481_v45 = vpop.f32.mrf.mxu0  ;;  %v524_v46 = vpop.f32.mrf.mxu1 }
 0x10f   :  { %v482_v59 = vadd.f32 %v481_v45, %v110_v49  ;;  %v525_v60 = vadd.f32 %v524_v46, %v118_v50 }
 0x110   :  { %v483_v51 = vpop.f32.mrf.mxu0  ;;  %v526_v52 = vpop.f32.mrf.mxu1 }
 0x111   :  { %v484_v55 = vadd.f32 %v483_v51, %v114_v47  ;;  %v527_v56 = vadd.f32 %v526_v52, %v122_v48  ;;  %v533_v7 = vmax.f32 %v482_v59, 0.0  ;;  %v535_v8 = vmax.f32 %v525_v60, 0.0 }
 0x112   :  { %v485_v53 = vpop.f32.mrf.mxu0  ;;  %v528_v54 = vpop.f32.mrf.mxu1 }
 0x113   :  { %v486_v57 = vadd.f32 %v485_v53, %v110_v49  ;;  %v529_v58 = vadd.f32 %v528_v54, %v118_v50  ;;  %v534_v3 = vmax.f32 %v484_v55, 0.0  ;;  %v536_v4 = vmax.f32 %v527_v56, 0.0 }
 0x114   :  { %v487_v61 = vpop.f32.mrf.mxu0  ;;  %v530_v62 = vpop.f32.mrf.mxu1 }
 0x115   :  { %v488_v63 = vadd.f32 %v487_v61, %v114_v47  ;;  %v531_v0 = vadd.f32 %v530_v62, %v122_v48  ;;  %v537_v1 = vmax.f32 %v486_v57, 0.0  ;;  %v539_v2 = vmax.f32 %v529_v58, 0.0 }
 0x117   :  { %v538_v5 = vmax.f32 %v488_v63, 0.0  ;;  %v540_v6 = vmax.f32 %v531_v0, 0.0  ;;  %v541_v11 = vpack.c.bf16 %v537_v1, %v533_v7  ;;  %v543_v12 = vpack.c.bf16 %v539_v2, %v535_v8 }
 0x119   :  { %v542_v9 = vpack.c.bf16 %v538_v5, %v534_v3  ;;  %v544_v10 = vpack.c.bf16 %v540_v6, %v536_v4 }
 0x11b   :  { %840 = vmatprep.mubr.bf16.mxu0 %v542_v9  ;;  %881 = vmatprep.mubr.bf16.mxu1 %v544_v10 }
 0x11c   :  { %841 = vmatmul.mubr.bf16.vlgmr.msra.gmra.mxu0 %v541_v11  ;;  %882 = vmatmul.mubr.bf16.vlgmr.msra.gmra.mxu1 %v543_v12 }
 0x1dc   :  { %v1010_v13 = vpop.f32.mrf.mxu0  ;;  %v1032_v14 = vpop.f32.mrf.mxu1 }
 0x1de   :  { %v1011_v16 = vpop.f32.mrf.mxu0  ;;  %v1033_v17 = vpop.f32.mrf.mxu1 }
 0x1df   :  { %v1012_v18 = vadd.f32 %v1011_v16, %v1010_v13  ;;  %v1034_v22 = vadd.f32 %v1033_v17, %v1032_v14 }
 0x1e0   :  { %v1013_v19 = vpop.f32.mrf.mxu0  ;;  %v1035_v20 = vpop.f32.mrf.mxu1 }
 0x1e1   :  { %v843_v21 = vadd.f32 %v1012_v18, %v961_v15 }
 0x1e2   :  { %v1014_v23 = vpop.f32.mrf.mxu0  ;;  %v1036_v24 = vpop.f32.mrf.mxu1 }
 0x1e3   :  { %v884_v25 = vadd.f32 %v1034_v22, %v843_v21  ;;  %v1015_v26 = vadd.f32 %v1014_v23, %v1013_v19  ;;  %v1037_v28 = vadd.f32 %v1036_v24, %v1035_v20 }
 0x1e5   :  { %890 = vst [vmem:[%s1352_s5] sm:$0xff] %v884_v25  ;;  %v846_v27 = vadd.f32 %v1015_v26, %v961_v15 }
 0x1e7   :  { %v887_v29 = vadd.f32 %v1037_v28, %v846_v27 }
 0x1e9   :  { %891 = vst [vmem:[%s1352_s5 + $0x8] sm:$0xff] %v887_v29 }
 0x1ea   :  { %896 = vsyncpa [#allocation3], 1 }

</bundles_post_ra>
